<compile_context>
chip_gen: v5e
topology: v5e:2x2
jax: 0.10.0
libtpu: 0.0.40
codegen_flags: <defaults>
</compile_context>

<pallas_src>
import functools

import jax
import jax.numpy as jnp
from jax.experimental import pallas as pl
from jax.experimental.pallas import tpu as pltpu


def _choose_tile_rows(n, c, itemsize, target_block_bytes=4 << 20):
    # Byte-targeted tiles: pick rows so one logits block is ~4 MiB regardless
    # of C, clamped to a multiple of 8 and to the (rounded-down) batch size.
    rows = target_block_bytes // max(1, c * itemsize)
    rows = max(8, (rows // 8) * 8)
    cap = max(8, (n // 8) * 8)          # keep the tile no larger than the batch
    return int(min(rows, cap))


def _focal_loss_kernel(logits_ref, targets_ref, out_ref, *, n_total):
    """One grid step: partial sum of per-row NLL over this row tile."""
    i = pl.program_id(0)
    x = logits_ref[...].astype(jnp.float32)              # (TN, C) f32 compute
    # TODO(synk): optional bf16 VPU/EUP path on v6e/v7x (keep max/sub/exp in
    # bf16, accumulate exp-sum / nll in f32) once HBM stops being the binding slot.
    t = targets_ref[...]                                  # (TN, 1) int32
    tn = x.shape[0]

    # Stable per-row log-sum-exp pieces (keepdims -> stay 2-D).
    m = jnp.max(x, axis=-1, keepdims=True)                             # (TN, 1)
    lse = jnp.log(jnp.sum(jnp.exp(x - m), axis=-1, keepdims=True))     # (TN, 1)

    # Target logit via iota-compare mask (no full log_probs / float one-hot).
    col = jax.lax.broadcasted_iota(jnp.int32, x.shape, 1)              # (TN, C)
    x_t = jnp.sum(jnp.where(col == t, x, 0.0), axis=-1, keepdims=True) # (TN, 1)

    nll = (m + lse) - x_t                                              # (TN, 1)

    if n_total % tn == 0:
        # Every tile is full: plain whole-tile reduce, no row mask anywhere.
        out_ref[...] = jnp.sum(nll, keepdims=True)
    else:
        last = pl.num_programs(0) - 1

        @pl.when(i < last)
        def _full_tiles():
            out_ref[...] = jnp.sum(nll, keepdims=True)

        @pl.when(i == last)
        def _partial_tile():
            # Mask rows past the true batch size; garbage NLL from undefined
            # out-of-bounds reads is never selected by the where.
            row = jax.lax.broadcasted_iota(jnp.int32, nll.shape, 0) + i * tn
            out_ref[...] = jnp.sum(jnp.where(row < n_total, nll, 0.0),
                                   keepdims=True)


def focal_loss(logits, targets, alpha=1.0, gamma=2.0, tile_rows=None):
    """logits: (N, C) float (f32/bf16); targets: (N,) int class ids -> scalar f32."""
    n, c = logits.shape
    itemsize = jnp.dtype(logits.dtype).itemsize
    if tile_rows is None:
        tn = _choose_tile_rows(n, c, itemsize)
    else:
        tn = max(8, (int(tile_rows) // 8) * 8)
    num_tiles = pl.cdiv(n, tn)

    targets2d = targets.astype(jnp.int32).reshape(n, 1)

    kernel = functools.partial(_focal_loss_kernel, n_total=int(n))

    # Per-tile partial sums (no serial accumulator) + "parallel" grid axis:
    # on v7x both TensorCores stream half the batch; neutral on v5e/v6e.
    partials = pl.pallas_call(
        kernel,
        out_shape=jax.ShapeDtypeStruct((num_tiles, 1, 1), jnp.float32),
        grid=(num_tiles,),
        in_specs=[
            pl.BlockSpec((tn, c), lambda i: (i, 0)),   # logits row tile
            pl.BlockSpec((tn, 1), lambda i: (i, 0)),   # matching targets tile
        ],
        out_specs=pl.BlockSpec((None, 1, 1), lambda i: (i, 0, 0)),
        compiler_params=pltpu.CompilerParams(
            dimension_semantics=("parallel",),
            vmem_limit_bytes=32 * 1024 * 1024,         # safe on v5e/v6e/v7x
        ),
    )(logits, targets2d)

    # Tiny epilogue in plain JAX: mean CE + focal transform on the scalar.
    ce = jnp.sum(partials) / n
    pt = jnp.exp(-ce)
    one_m_pt = 1.0 - pt
    if float(gamma) == 2.0:
        focal = one_m_pt * one_m_pt                    # two muls, no pow edge cases
    else:
        focal = one_m_pt ** gamma
    return (alpha * focal * ce).astype(jnp.float32)


def focal_loss_ref(logits, targets, alpha=1.0, gamma=2.0):
    """Plain-JAX reference mirroring the PyTorch module."""
    logp = jax.nn.log_softmax(logits.astype(jnp.float32), axis=-1)
    nll = -jnp.take_along_axis(logp, targets[:, None].astype(jnp.int32), axis=-1)[:, 0]
    ce = jnp.mean(nll)
    pt = jnp.exp(-ce)
    return alpha * (1.0 - pt) ** gamma * ce


if __name__ == "__main__":
    key = jax.random.PRNGKey(0)
    k1, k2, k3, k4 = jax.random.split(key, 4)

    # Case 1: small single-tile problem (8 samples x 32 classes).
    N, C = 8, 32
    logits = jax.random.normal(k1, (N, C), dtype=jnp.float32)
    targets = jax.random.randint(k2, (N,), 0, C, dtype=jnp.int32)
    out = jax.block_until_ready(focal_loss(logits, targets))
    ref = focal_loss_ref(logits, targets)
    assert jnp.allclose(out, ref, rtol=1e-5, atol=1e-5), (out, ref)

    # Case 2: multiple tiles + partial last tile (N=20, tn=8 -> 3 tiles, last
    # tile has only 4 valid rows) exercising the masked-reduction path.
    N2, C2 = 20, 32
    logits2 = jax.random.normal(k3, (N2, C2), dtype=jnp.float32)
    targets2 = jax.random.randint(k4, (N2,), 0, C2, dtype=jnp.int32)
    out2 = jax.block_until_ready(focal_loss(logits2, targets2, tile_rows=8))
    ref2 = focal_loss_ref(logits2, targets2)
    assert jnp.allclose(out2, ref2, rtol=1e-5, atol=1e-5), (out2, ref2)

    # Case 3: same inputs, auto (byte-targeted) tile size -> 2 tiles of 16 rows,
    # second one partial, exercising the auto-sizing + mask path.
    out3 = jax.block_until_ready(focal_loss(logits2, targets2))
    assert jnp.allclose(out3, ref2, rtol=1e-5, atol=1e-5), (out3, ref2)

    print("KERNEL_OK")
</pallas_src>

<mosaic_0001>
module attributes {stable_mosaic.version = 11 : i64} {
  func.func @_focal_loss_kernel(%arg0: i32, %arg1: memref<8x32xf32, #tpu.memory_space<vmem>>, %arg2: memref<8x1xi32, #tpu.memory_space<vmem>>, %arg3: memref<1x1x1xf32, #tpu.memory_space<vmem>>) attributes {dimension_semantics = [#tpu.dimension_semantics<parallel>], iteration_bounds = array<i64: 1>, scalar_prefetch = 0 : i64, scratch_operands = 0 : i64, tpu.core_type = #tpu.core_type<tc>, window_params = [{transform_indices = @transform_0, window_bounds = array<i64: 8, 32>}, {transform_indices = @transform_1, window_bounds = array<i64: 8, 1>}, {transform_indices = @transform_2, window_bounds = array<i64: 1, 1, 1>}]} {
    %c0 = arith.constant 0 : index
    %c0_0 = arith.constant 0 : index
    %0 = vector.load %arg1[%c0, %c0_0] : memref<8x32xf32, #tpu.memory_space<vmem>>, vector<8x32xf32>
    %c0_1 = arith.constant 0 : index
    %c0_2 = arith.constant 0 : index
    %1 = vector.load %arg2[%c0_1, %c0_2] : memref<8x1xi32, #tpu.memory_space<vmem>>, vector<8x1xi32>
    %cst = arith.constant dense<0xFF800000> : vector<8xf32>
    %2 = vector.multi_reduction <maximumf>, %0, %cst [1] : vector<8x32xf32> to vector<8xf32>
    %3 = vector.shape_cast %2 : vector<8xf32> to vector<8x1xf32>
    %4 = vector.broadcast %3 : vector<8x1xf32> to vector<8x32xf32>
    %5 = arith.subf %0, %4 : vector<8x32xf32>
    %6 = math.exp %5 : vector<8x32xf32>
    %cst_3 = arith.constant dense<0.000000e+00> : vector<8xf32>
    %7 = vector.multi_reduction <add>, %6, %cst_3 [1] : vector<8x32xf32> to vector<8xf32>
    %8 = vector.shape_cast %7 : vector<8xf32> to vector<8x1xf32>
    %9 = math.log %8 : vector<8x1xf32>
    %10 = tpu.iota {dimensions = array<i32: 1>} : vector<8x32xi32>
    %11 = vector.broadcast %1 : vector<8x1xi32> to vector<8x32xi32>
    %12 = arith.cmpi eq, %10, %11 : vector<8x32xi32>
    %cst_4 = arith.constant 0.000000e+00 : f32
    %13 = vector.broadcast %cst_4 : f32 to vector<8x32xf32>
    %14 = arith.select %12, %0, %13 : vector<8x32xi1>, vector<8x32xf32>
    %cst_5 = arith.constant dense<0.000000e+00> : vector<8xf32>
    %15 = vector.multi_reduction <add>, %14, %cst_5 [1] : vector<8x32xf32> to vector<8xf32>
    %16 = vector.shape_cast %15 : vector<8xf32> to vector<8x1xf32>
    %17 = arith.addf %3, %9 : vector<8x1xf32>
    %18 = arith.subf %17, %16 : vector<8x1xf32>
    %19 = vector.shape_cast %18 : vector<8x1xf32> to vector<1x8x1xf32>
    %cst_6 = arith.constant dense<0.000000e+00> : vector<1xf32>
    %20 = vector.multi_reduction <add>, %19, %cst_6 [1, 2] : vector<1x8x1xf32> to vector<1xf32>
    %21 = vector.shape_cast %20 : vector<1xf32> to vector<1x1x1xf32>
    %22 = vector.extract %21[0, 0, 0] : f32 from vector<1x1x1xf32>
    %23 = vector.broadcast %22 : f32 to vector<1x1xf32>
    %c0_7 = arith.constant 0 : index
    %c0_8 = arith.constant 0 : index
    %c0_9 = arith.constant 0 : index
    %24 = vector.load %arg3[%c0_7, %c0_8, %c0_9] : memref<1x1x1xf32, #tpu.memory_space<vmem>>, vector<1x1x1xf32>
    %25 = vector.shape_cast %24 : vector<1x1x1xf32> to vector<1x1xf32>
    %26 = vector.shape_cast %23 : vector<1x1xf32> to vector<1x1x1xf32>
    tpu.vector_store %arg3[%c0_7, %c0_8, %c0_9], %26 {strides = array<i32>} : memref<1x1x1xf32, #tpu.memory_space<vmem>>, vector<1x1x1xf32>,
    return
  }
  func.func @transform_0(%arg0: i32) -> (i32, i32) {
    %c0_i32 = arith.constant 0 : i32
    %c0_i32_0 = arith.constant 0 : i32
    return %arg0, %c0_i32 : i32, i32
  }
  func.func @transform_1(%arg0: i32) -> (i32, i32) {
    %c0_i32 = arith.constant 0 : i32
    %c0_i32_0 = arith.constant 0 : i32
    return %arg0, %c0_i32 : i32, i32
  }
  func.func @transform_2(%arg0: i32) -> (i32, i32, i32) {
    %c0_i32 = arith.constant 0 : i32
    %c0_i32_0 = arith.constant 0 : i32
    %c0_i32_1 = arith.constant 0 : i32
    return %arg0, %c0_i32, %c0_i32_0 : i32, i32, i32
  }
}

</mosaic_0001>

<bundles_post_ra>
// kernel: tpu_custom_call.1
= control target key start
LH: loop header
LB: loop body
LE: loop exit
PB: predicated region body
PF: predicated region fallthrough
CT: control target
= control target key end

     0   :  { %vm14_vm0 = vcmask 261120   ;;  %s132_s0 = inlined_call_operand.vmem [shape: f32[8,32], index: 0, kind: input, shape index: {}]   ;;  %s133_s1 = inlined_call_operand.vmem [shape: s32[8,1], index: 1, kind: input, shape index: {}]   ;;  %s134_s2 = inlined_call_operand.hbm [shape: f32[1,1,1], index: 2, kind: output, shape index: {}]  }
   0x1   :  { %v12_v0 = vld [vmem:[%s132_s0] sm:$0xff] }
   0x2   :  { %7 = vsyncpa [#allocation3], 0  ;;  %v15_v1 = vsel %vm14_vm0, %v12_v0, -inf  ;;  %v103_v2 = vmov 0   ;;  %v13_v3 = vld [vmem:[%s133_s1] sm:$0xff]  ;;  %v26_v9 = vlaneseq  ;;  %vm38_vm2 = vcmask 7168  }
   0x3   :  { %72 = vset.pattern.permute.xlu0 %v103_v2  ;;  %s104_s0 = smov [#allocation2]   ;;  %s59_s15 = sshll.u32 %s134_s2, 4  ;;  %vm50_vm3 = vcmask 0   ;;  %s60_s15 = int_to_ptr.hbm [resolvable:$true] %s59_s15 }
   0x4   :  { %16 = vmax.xlane.f32.xlu0 %v15_v1  ;;  %v27_v10 = vand.u32 127, %v26_v9  ;;  %s57_s1 = sshll.u32 %s104_s0, 4  ;;  %s58_s1 = int_to_ptr.vmem [resolvable:$true] %s57_s1 }
  0x18   :  { %29 = vperm.xlu0 %72, %v13_v3  }
  0x77   :  { %v17_v4 = vpop.xlane.xlu0 %16 }
  0x78   :  { %v18_v5 = vsub.f32 %v12_v0, %v17_v4 }
  0x7a   :  { %v19_v6 = vmul.f32 1.442695, %v18_v5 }
  0x7c   :  { %73 = vpow2.f32 %v19_v6 }
  0x82   :  { %v74_v7 = vpop.eup %73 }
  0x83   :  { %v21_v8 = vsel %vm14_vm0, %v74_v7, 0.0 }
  0x84   :  { %22 = vadd.xlane.f32.xlu1 %v21_v8 }
  0x8a   :  { %v30_v11 = vpop.permute.xlu0 %29 }
  0x8b   :  { %vm31_vm1 = vcmp.eq.s32.totalorder %v27_v10, %v30_v11 }
  0x8c   :  { %v32_v12 = vsel %vm31_vm1, %v12_v0, 0.0 }
  0x8d   :  { %v33_v13 = vsel %vm14_vm0, %v32_v12, 0.0 }
  0x8e   :  { %34 = vadd.xlane.f32.xlu1 %v33_v13 }
  0xf7   :  { %v23_v14 = vpop.xlane.xlu1 %22 }
  0xf8   :  { %75 = vlog2.f32 %v23_v14 }
  0xfe   :  { %v76_v15 = vpop.eup %75 }
  0xff   :  { %v25_v16 = vmul.f32 0.6931472, %v76_v15 }
 0x101   :  { %v36_v17 = vadd.f32 %v25_v16, %v17_v4  ;;  %v35_v18 = vpop.xlane.xlu1 %34 }
 0x103   :  { %v37_v19 = vsub.f32 %v36_v17, %v35_v18 }
 0x105   :  { %v39_v20 = vsel %vm38_vm2, %v37_v19, 0.0 }
 0x106   :  { %40 = vadd.xlane.f32.xlu2 %v39_v20 }
 0x179   :  { %v41_v21 = vpop.xlane.xlu2 %40 }
 0x17a   :  { %v42_v22 = vrot.slane %v41_v21, 4 }
 0x17c   :  { %v43_v23 = vadd.f32 %v42_v22, %v41_v21 }
 0x17e   :  { %v44_v24 = vrot.slane %v43_v23, 2 }
 0x180   :  { %v45_v25 = vadd.f32 %v44_v24, %v43_v23 }
 0x182   :  { %v46_v26 = vrot.slane %v45_v25, 1 }
 0x184   :  { %v47_v27 = vadd.f32 %v46_v26, %v45_v25 }
 0x186   :  { %68 = vpush %v47_v27 }
 0x1b7   :  { %s69_s16 = spop %68 }
 0x1b8   :  { %v49_v28 = vstv %s69_s16 }
 0x1b9   :  { %51 = vst.msk [vmem:[#allocation2] sm:$0x1] %vm50_vm3, %v49_v28 }
 0x1ba   :  { %62 = dma.vmem_to_hbm [thread:$0]  %s58_s1, 16, %s60_s15, [#allocation3]  }
 0x1bb   :  { %101 = dma.done.wait [#allocation3], 16  }
 0x1bc   :  { %102 = vsyncadd [#allocation3], 4294967280 }
 0x1bd   :  { %67 = vsyncpa [#allocation3], 1 }

</bundles_post_ra>
